<compile_context>
chip_gen: v7x
topology: tpu7x:2x2x1
jax: 0.10.0
libtpu: 0.0.40
codegen_flags: <defaults>
</compile_context>

<pallas_src>
import math
import functools

import jax
import jax.numpy as jnp
from jax.experimental import pallas as pl
from jax.experimental.pallas import tpu as pltpu


_BIAS_ROWS = 8  # bias stored as one row per layer, padded to 8 rows for sublane alignment


# ----------------------------------------------------------------------------
# Fused decoder kernel
# ----------------------------------------------------------------------------

def _fused_decoder_kernel(norm_mode, layer_dims, inv_count, *refs):
    """refs = ([norm_scalars,] x, targets, param_slab, decoding_out, loss_out, loss_acc).

    norm_mode  : "none" | "in_kernel" | "precomputed"
    layer_dims : tuple of (fin_padded, fout_padded) per layer (static)
    inv_count  : 1 / (B * Fout) for the MSE mean (static python float)
    """
    idx = 0
    if norm_mode == "precomputed":
        norm_ref = refs[idx]
        idx += 1
    x_ref, t_ref, p_ref, out_ref, loss_ref, acc_ref = refs[idx:idx + 6]

    bi = pl.program_id(0)
    nb = pl.num_programs(0)

    # Cast inside the kernel (no separate HBM-round-trip astype in the wrapper).
    x = x_ref[...].astype(jnp.float32)

    if norm_mode == "in_kernel":
        # (x - x.min()) / (x.max() - x.min()) over the whole tensor (exact divide).
        mn = jnp.min(x)
        mx = jnp.max(x)
        x = (x - mn) / (mx - mn)
    elif norm_mode == "precomputed":
        # Global min / 1/(max-min) precomputed in the wrapper (batch is tiled,
        # so a per-block min/max would not match the torch semantics).
        mn = norm_ref[0]
        inv_range = norm_ref[1]
        x = (x - mn) * inv_range

    # All layers (including the output layer) are Linear + LeakyReLU(0.01).
    # Weights/biases are static slices of the single packed slab.
    row = 0
    for (fin_p, fout_p) in layer_dims:
        w = p_ref[row:row + fin_p, :fout_p]                       # (fin_p, fout_p)
        b = p_ref[row + fin_p:row + fin_p + 1, :fout_p]           # (1, fout_p)
        y = jnp.dot(x, w, preferred_element_type=jnp.float32) + b
        x = jnp.maximum(y, 0.01 * y)                              # LeakyReLU(0.01)
        row += fin_p + _BIAS_ROWS

    out_ref[...] = x.astype(out_ref.dtype)

    # F.mse_loss(decoding, targets), 'mean' reduction, accumulated across batch blocks.
    d = x - t_ref[...].astype(jnp.float32)
    partial = jnp.sum(d * d)

    @pl.when(bi == 0)
    def _():
        acc_ref[0] = jnp.float32(0.0)

    acc_ref[0] += partial

    @pl.when(bi == nb - 1)
    def _():
        loss_ref[0, 0] = acc_ref[0] * inv_count


def _choose_batch_block(batch):
    """Pick a batch tile: whole batch if small, else a sublane-aligned divisor."""
    if batch <= 512:
        return batch
    for cand in (512, 256, 128, 64, 32, 16, 8):
        if batch % cand == 0:
            return cand
    return batch  # fall back to a single resident block


def fused_decoder_forward(x, targets, param_slab, layer_dims, norm_inputs=True):
    """Single pallas_call running norm -> all layers -> MSE.

    x          : (B, Fin)   any float dtype (cast to f32 in-kernel)
    targets    : (B, Fout)  any float dtype (cast to f32 in-kernel)
    param_slab : (rows, maxw) f32, packed lane-padded weights+biases
    layer_dims : tuple of (fin_padded, fout_padded)
    Returns (decoding (B, Fout) f32, loss () f32)."""
    B, Fin = x.shape
    Bt, Fout = targets.shape
    assert Bt == B
    assert layer_dims[0][0] == Fin, "first layer input width must match flattened inputs"
    assert layer_dims[-1][1] == Fout, "output layer must stay unpadded to match targets"

    block_b = _choose_batch_block(B)
    nblocks = B // block_b

    if norm_inputs:
        norm_mode = "in_kernel" if nblocks == 1 else "precomputed"
    else:
        norm_mode = "none"

    inv_count = 1.0 / float(B * Fout)
    kernel = functools.partial(_fused_decoder_kernel, norm_mode, layer_dims, inv_count)

    operands = []
    in_specs = []
    if norm_mode == "precomputed":
        xf = x.astype(jnp.float32)
        mn = jnp.min(xf)
        mx = jnp.max(xf)
        norm_scalars = jnp.stack([mn, 1.0 / (mx - mn)]).astype(jnp.float32)  # (2,)
        operands.append(norm_scalars)
        in_specs.append(pl.BlockSpec(memory_space=pltpu.SMEM))

    operands += [x, targets, param_slab]
    in_specs += [
        pl.BlockSpec((block_b, Fin), lambda i: (i, 0)),          # x      : batch-tiled
        pl.BlockSpec((block_b, Fout), lambda i: (i, 0)),         # targets: batch-tiled
        pl.BlockSpec(param_slab.shape, lambda i: (0, 0)),        # slab   : VMEM-resident
    ]

    out_shape = (
        jax.ShapeDtypeStruct((B, Fout), jnp.float32),            # decoding
        jax.ShapeDtypeStruct((1, 1), jnp.float32),               # loss (scalar)
    )
    out_specs = (
        pl.BlockSpec((block_b, Fout), lambda i: (i, 0)),
        pl.BlockSpec(memory_space=pltpu.SMEM),
    )

    # Advisory cost estimate (padded dims).
    flops = 0
    for (fin_p, fout_p) in layer_dims:
        flops += 2 * B * fin_p * fout_p + 3 * B * fout_p
    flops += 3 * B * Fin + 3 * B * Fout
    bytes_accessed = 4 * (x.size + targets.size + param_slab.size + B * Fout + 1)

    decoding, loss = pl.pallas_call(
        kernel,
        grid=(nblocks,),
        out_shape=out_shape,
        in_specs=in_specs,
        out_specs=out_specs,
        scratch_shapes=[pltpu.SMEM((1,), jnp.float32)],          # MSE partial-sum accumulator
        compiler_params=pltpu.CompilerParams(
            dimension_semantics=("arbitrary",),                  # loss accumulates over batch blocks
        ),
        cost_estimate=pl.CostEstimate(
            flops=flops, transcendentals=0, bytes_accessed=bytes_accessed
        ),
    )(*operands)
    return decoding, loss[0, 0]


# ----------------------------------------------------------------------------
# Parameter construction (mirrors CLS.build() decoder) + packed lane-dense slab
# ----------------------------------------------------------------------------

def init_decoder_params(key, input_size, units, num_layers, output_size):
    """[Linear(in, units[i]) + LeakyReLU] * num_layers, then
       Linear(units[-1], output_size) + LeakyReLU.
    PyTorch default Linear init (uniform +-1/sqrt(fan_in)), synthetic weights.
    Weights stored (in_features, out_features) so the kernel computes x @ W + b
    (== torch's x @ W.T + b)."""
    params = []
    in_size = input_size
    hidden = units[0]
    for i in range(num_layers):
        key, kw, kb = jax.random.split(key, 3)
        bound = 1.0 / math.sqrt(in_size)
        w = jax.random.uniform(kw, (in_size, hidden), jnp.float32, -bound, bound)
        b = jax.random.uniform(kb, (1, hidden), jnp.float32, -bound, bound)
        params.append((w, b))
        if i < num_layers - 1:
            in_size = hidden
            hidden = units[i + 1]
    key, kw, kb = jax.random.split(key, 3)
    bound = 1.0 / math.sqrt(hidden)
    w = jax.random.uniform(kw, (hidden, output_size), jnp.float32, -bound, bound)
    b = jax.random.uniform(kb, (1, output_size), jnp.float32, -bound, bound)
    params.append((w, b))
    return params


def _round_up(n, m):
    return ((n + m - 1) // m) * m


def pack_decoder_params(params):
    """Pack all (W, b) into ONE lane-padded f32 slab.

    Per layer the slab holds `fin_padded` weight rows (columns zero-padded to a
    multiple of 128 lanes, except the final output layer which stays unpadded
    to match the targets) followed by 8 rows holding the bias in row 0.
    Zero padding is semantics-preserving: padded weight columns/bias entries
    are zero, so padded activations are LeakyReLU(0) == 0 and the next layer's
    padded weight rows are zero as well.

    Returns (slab (rows, maxw) f32, layer_dims tuple of (fin_padded, fout_padded)).
    """
    n = len(params)
    fin0 = params[0][0].shape[0]
    assert fin0 % 8 == 0, "flattened input feature count must be sublane (8) aligned"

    dims = []
    prev = fin0
    for i, (w, _) in enumerate(params):
        _, fout = w.shape
        fout_p = fout if i == n - 1 else _round_up(fout, 128)
        dims.append((prev, fout_p))
        prev = fout_p

    maxw = max(d[1] for d in dims)
    total_rows = sum(d[0] + _BIAS_ROWS for d in dims)
    slab = jnp.zeros((total_rows, maxw), jnp.float32)

    row = 0
    for (fin_p, fout_p), (w, b) in zip(dims, params):
        fin, fout = w.shape
        slab = slab.at[row:row + fin, :fout].set(w.astype(jnp.float32))
        slab = slab.at[row + fin_p, :fout].set(b.reshape(-1).astype(jnp.float32))
        row += fin_p + _BIAS_ROWS

    return slab, tuple(dims)


# ----------------------------------------------------------------------------
# forward_decoder (inference path of CLS.forward_decoder, no optimizer step)
# ----------------------------------------------------------------------------

def forward_decoder(param_slab, layer_dims, inputs, targets, norm_inputs=True):
    """inputs : LTM-encoding tensor, NCHW (B, C, H, W)
       targets: image tensor, NCHW (B, C, H, W)
       Returns (loss, decoding) with decoding reshaped to targets.shape."""
    output_shape = targets.shape
    x = inputs.reshape(inputs.shape[0], -1)      # torch.flatten(start_dim=1); cast is in-kernel
    t = targets.reshape(targets.shape[0], -1)

    decoding, loss = fused_decoder_forward(
        x, t, param_slab, layer_dims, norm_inputs=norm_inputs
    )
    return loss, decoding.reshape(output_shape)


# ----------------------------------------------------------------------------
# Main
# ----------------------------------------------------------------------------

if __name__ == "__main__":
    key = jax.random.PRNGKey(0)
    k_in, k_tgt, k_params = jax.random.split(key, 3)

    # Small shapes consistent with the module:
    #   - `next_input` (LTM output / decoder input): (B, 4, 8, 8)  -> 256 features
    #   - `output_shape` == `input_shape` (images):  (B, 1, 16, 16) -> 256 features
    batch = 2
    ltm_encoding = jax.random.normal(k_in, (batch, 4, 8, 8), jnp.float32)
    images = jax.random.uniform(k_tgt, (batch, 1, 16, 16), jnp.float32)

    decoder_config = {
        "num_layers": 2,
        "units": [64, 32],
        "norm_inputs": True,
    }
    params = init_decoder_params(
        k_params,
        input_size=4 * 8 * 8,
        units=decoder_config["units"],
        num_layers=decoder_config["num_layers"],
        output_size=1 * 16 * 16,
    )
    param_slab, layer_dims = pack_decoder_params(params)

    loss, decoding = forward_decoder(
        param_slab, layer_dims, ltm_encoding, images,
        norm_inputs=decoder_config["norm_inputs"],
    )
    jax.block_until_ready((loss, decoding))

    assert decoding.shape == images.shape
    assert loss.shape == ()
    print("KERNEL_OK")
</pallas_src>

<mosaic_0001>
module attributes {stable_mosaic.version = 11 : i64} {
  func.func @_fused_decoder_kernel(%arg0: i32, %arg1: memref<2x256xf32, #tpu.memory_space<vmem>>, %arg2: memref<2x256xf32, #tpu.memory_space<vmem>>, %arg3: memref<536x256xf32, #tpu.memory_space<vmem>>, %arg4: memref<2x256xf32, #tpu.memory_space<vmem>>, %arg5: memref<1x1xf32, #tpu.memory_space<smem>>, %arg6: memref<1xf32, #tpu.memory_space<smem>>) attributes {dimension_semantics = [#tpu.dimension_semantics<arbitrary>], iteration_bounds = array<i64: 1>, scalar_prefetch = 0 : i64, scratch_operands = 1 : i64, tpu.core_type = #tpu.core_type<tc>, window_params = [{transform_indices = @transform_0, window_bounds = array<i64: 2, 256>}, {transform_indices = @transform_1, window_bounds = array<i64: 2, 256>}, {pipeline_mode = #tpu.pipeline_mode<synchronous>, transform_indices = @transform_2, window_bounds = array<i64: 536, 256>}, {transform_indices = @transform_3, window_bounds = array<i64: 2, 256>}, {transform_indices = @transform_4, window_bounds = array<i64: 1, 1>}]} {
    %c0 = arith.constant 0 : index
    %c0_0 = arith.constant 0 : index
    %0 = vector.load %arg1[%c0, %c0_0] : memref<2x256xf32, #tpu.memory_space<vmem>>, vector<2x256xf32>
    %1 = vector.shape_cast %0 : vector<2x256xf32> to vector<1x2x256xf32>
    %cst = arith.constant dense<0x7F800000> : vector<1xf32>
    %2 = vector.multi_reduction <minimumf>, %1, %cst [1, 2] : vector<1x2x256xf32> to vector<1xf32>
    %3 = vector.shape_cast %2 : vector<1xf32> to vector<1x1x1xf32>
    %4 = vector.extract %3[0, 0, 0] : f32 from vector<1x1x1xf32>
    %5 = vector.shape_cast %0 : vector<2x256xf32> to vector<1x2x256xf32>
    %cst_1 = arith.constant dense<0xFF800000> : vector<1xf32>
    %6 = vector.multi_reduction <maximumf>, %5, %cst_1 [1, 2] : vector<1x2x256xf32> to vector<1xf32>
    %7 = vector.shape_cast %6 : vector<1xf32> to vector<1x1x1xf32>
    %8 = vector.extract %7[0, 0, 0] : f32 from vector<1x1x1xf32>
    %9 = vector.broadcast %4 : f32 to vector<2x256xf32>
    %10 = arith.subf %0, %9 : vector<2x256xf32>
    %11 = arith.subf %8, %4 : f32
    %12 = vector.broadcast %11 : f32 to vector<2x256xf32>
    %13 = arith.divf %10, %12 : vector<2x256xf32>
    %c0_2 = arith.constant 0 : index
    %c0_3 = arith.constant 0 : index
    %14 = vector.load %arg3[%c0_2, %c0_3] : memref<536x256xf32, #tpu.memory_space<vmem>>, vector<256x128xf32>
    %c256 = arith.constant 256 : index
    %c0_4 = arith.constant 0 : index
    %15 = vector.load %arg3[%c256, %c0_4] : memref<536x256xf32, #tpu.memory_space<vmem>>, vector<1x128xf32>
    %cst_5 = arith.constant dense<0.000000e+00> : vector<2x128xf32>
    %16 = tpu.matmul %13, %14, %cst_5 {dimension_numbers = #tpu.dot_dimension_numbers<[1], [0], [0], [1], [0, 0, 1, 1], [], []>} : vector<2x256xf32>, vector<256x128xf32>, vector<2x128xf32> -> vector<2x128xf32>
    %17 = vector.broadcast %15 : vector<1x128xf32> to vector<2x128xf32>
    %18 = arith.addf %16, %17 : vector<2x128xf32>
    %cst_6 = arith.constant 0.00999999977 : f32
    %19 = vector.broadcast %cst_6 : f32 to vector<2x128xf32>
    %20 = arith.mulf %19, %18 : vector<2x128xf32>
    %21 = arith.maximumf %18, %20 : vector<2x128xf32>
    %c264 = arith.constant 264 : index
    %c0_7 = arith.constant 0 : index
    %22 = vector.load %arg3[%c264, %c0_7] : memref<536x256xf32, #tpu.memory_space<vmem>>, vector<128x128xf32>
    %c392 = arith.constant 392 : index
    %c0_8 = arith.constant 0 : index
    %23 = vector.load %arg3[%c392, %c0_8] : memref<536x256xf32, #tpu.memory_space<vmem>>, vector<1x128xf32>
    %cst_9 = arith.constant dense<0.000000e+00> : vector<2x128xf32>
    %24 = tpu.matmul %21, %22, %cst_9 {dimension_numbers = #tpu.dot_dimension_numbers<[1], [0], [0], [1], [0, 0, 1, 1], [], []>} : vector<2x128xf32>, vector<128x128xf32>, vector<2x128xf32> -> vector<2x128xf32>
    %25 = vector.broadcast %23 : vector<1x128xf32> to vector<2x128xf32>
    %26 = arith.addf %24, %25 : vector<2x128xf32>
    %cst_10 = arith.constant 0.00999999977 : f32
    %27 = vector.broadcast %cst_10 : f32 to vector<2x128xf32>
    %28 = arith.mulf %27, %26 : vector<2x128xf32>
    %29 = arith.maximumf %26, %28 : vector<2x128xf32>
    %c400 = arith.constant 400 : index
    %c0_11 = arith.constant 0 : index
    %30 = vector.load %arg3[%c400, %c0_11] : memref<536x256xf32, #tpu.memory_space<vmem>>, vector<128x256xf32>
    %c528 = arith.constant 528 : index
    %c0_12 = arith.constant 0 : index
    %31 = vector.load %arg3[%c528, %c0_12] : memref<536x256xf32, #tpu.memory_space<vmem>>, vector<1x256xf32>
    %cst_13 = arith.constant dense<0.000000e+00> : vector<2x256xf32>
    %32 = tpu.matmul %29, %30, %cst_13 {dimension_numbers = #tpu.dot_dimension_numbers<[1], [0], [0], [1], [0, 0, 1, 1], [], []>} : vector<2x128xf32>, vector<128x256xf32>, vector<2x256xf32> -> vector<2x256xf32>
    %33 = vector.broadcast %31 : vector<1x256xf32> to vector<2x256xf32>
    %34 = arith.addf %32, %33 : vector<2x256xf32>
    %cst_14 = arith.constant 0.00999999977 : f32
    %35 = vector.broadcast %cst_14 : f32 to vector<2x256xf32>
    %36 = arith.mulf %35, %34 : vector<2x256xf32>
    %37 = arith.maximumf %34, %36 : vector<2x256xf32>
    %c0_15 = arith.constant 0 : index
    %c0_16 = arith.constant 0 : index
    %38 = vector.load %arg4[%c0_15, %c0_16] : memref<2x256xf32, #tpu.memory_space<vmem>>, vector<2x256xf32>
    tpu.vector_store %arg4[%c0_15, %c0_16], %37 {strides = array<i32>} : memref<2x256xf32, #tpu.memory_space<vmem>>, vector<2x256xf32>,
    %c0_17 = arith.constant 0 : index
    %c0_18 = arith.constant 0 : index
    %39 = vector.load %arg2[%c0_17, %c0_18] : memref<2x256xf32, #tpu.memory_space<vmem>>, vector<2x256xf32>
    %40 = arith.subf %37, %39 : vector<2x256xf32>
    %41 = arith.mulf %40, %40 : vector<2x256xf32>
    %42 = vector.shape_cast %41 : vector<2x256xf32> to vector<1x2x256xf32>
    %cst_19 = arith.constant dense<0.000000e+00> : vector<1xf32>
    %43 = vector.multi_reduction <add>, %42, %cst_19 [1, 2] : vector<1x2x256xf32> to vector<1xf32>
    %44 = vector.shape_cast %43 : vector<1xf32> to vector<1x1x1xf32>
    %45 = vector.extract %44[0, 0, 0] : f32 from vector<1x1x1xf32>
    %c0_i32 = arith.constant 0 : i32
    %46 = arith.cmpi eq, %arg0, %c0_i32 : i32
    %47 = arith.extui %46 : i1 to i32
    %c0_i32_20 = arith.constant 0 : i32
    %48 = arith.cmpi ne, %47, %c0_i32_20 : i32
    scf.if %48 {
      %cst_25 = arith.constant 0.000000e+00 : f32
      %c0_26 = arith.constant 0 : index
      %55 = memref.load %arg6[%c0_26] : memref<1xf32, #tpu.memory_space<smem>>
      memref.store %cst_25, %arg6[%c0_26] : memref<1xf32, #tpu.memory_space<smem>>
    } else {
    }
    %c0_21 = arith.constant 0 : index
    %49 = memref.load %arg6[%c0_21] : memref<1xf32, #tpu.memory_space<smem>>
    %50 = arith.addf %49, %45 : f32
    %c0_22 = arith.constant 0 : index
    %51 = memref.load %arg6[%c0_22] : memref<1xf32, #tpu.memory_space<smem>>
    memref.store %50, %arg6[%c0_22] : memref<1xf32, #tpu.memory_space<smem>>
    %c0_i32_23 = arith.constant 0 : i32
    %52 = arith.cmpi eq, %arg0, %c0_i32_23 : i32
    %53 = arith.extui %52 : i1 to i32
    %c0_i32_24 = arith.constant 0 : i32
    %54 = arith.cmpi ne, %53, %c0_i32_24 : i32
    scf.if %54 {
      %c0_25 = arith.constant 0 : index
      %55 = memref.load %arg6[%c0_25] : memref<1xf32, #tpu.memory_space<smem>>
      %cst_26 = arith.constant 0.001953125 : f32
      %56 = arith.mulf %55, %cst_26 : f32
      %c0_27 = arith.constant 0 : index
      %c0_28 = arith.constant 0 : index
      %57 = memref.load %arg5[%c0_27, %c0_28] : memref<1x1xf32, #tpu.memory_space<smem>>
      memref.store %56, %arg5[%c0_27, %c0_28] : memref<1x1xf32, #tpu.memory_space<smem>>
    } else {
    }
    return
  }
  func.func @transform_0(%arg0: i32) -> (i32, i32) {
    %c0_i32 = arith.constant 0 : i32
    %c0_i32_0 = arith.constant 0 : i32
    return %arg0, %c0_i32 : i32, i32
  }
  func.func @transform_1(%arg0: i32) -> (i32, i32) {
    %c0_i32 = arith.constant 0 : i32
    %c0_i32_0 = arith.constant 0 : i32
    return %arg0, %c0_i32 : i32, i32
  }
  func.func @transform_2(%arg0: i32) -> (i32, i32) {
    %c0_i32 = arith.constant 0 : i32
    %c0_i32_0 = arith.constant 0 : i32
    %c0_i32_1 = arith.constant 0 : i32
    return %c0_i32, %c0_i32_0 : i32, i32
  }
  func.func @transform_3(%arg0: i32) -> (i32, i32) {
    %c0_i32 = arith.constant 0 : i32
    %c0_i32_0 = arith.constant 0 : i32
    return %arg0, %c0_i32 : i32, i32
  }
  func.func @transform_4(%arg0: i32) -> (i32, i32) {
    %c0_i32 = arith.constant 0 : i32
    %c0_i32_0 = arith.constant 0 : i32
    %c0_i32_1 = arith.constant 0 : i32
    return %c0_i32, %c0_i32_0 : i32, i32
  }
}

</mosaic_0001>

<bundles_post_ra>
// kernel: tpu_custom_call.1
= control target key start
LH: loop header
LB: loop body
LE: loop exit
PB: predicated region body
PF: predicated region fallthrough
CT: control target
= control target key end

     0   :  { %10 = vsyncpa [#allocation4], 0  ;;  %s926_s0 = inlined_call_operand.hbm [shape: f32[2,256], index: 0, kind: input, shape index: {}]   ;;  %s927_s1 = inlined_call_operand.hbm [shape: f32[2,256], index: 1, kind: input, shape index: {}]   ;;  %s928_s2 = inlined_call_operand.hbm [shape: f32[536,256], index: 2, kind: input, shape index: {}]   ;;  %s929_s3 = inlined_call_operand.hbm [shape: f32[2,256], index: 3, kind: output, shape index: {0}]   ;;  %s930_s4 = inlined_call_operand.hbm [shape: f32[1,1], index: 4, kind: output, shape index: {1}]  }
   0x1   :  { %11 = vsyncpa [#allocation8], 0 }
   0x2   :  { %12 = vsyncpa [#allocation5], 0 }
   0x3   :  { %13 = vsyncpa [#allocation6], 0  ;;  %s811_s15 = smov [#allocation7]   ;;  %s812_s17 = smov [#allocation3]  }
   0x4   :  { %s30_s16 = sshll.u32 %s811_s15, 4  ;;  %s20_s18 = sshll.u32 %s812_s17, 4  ;;  %s31_s16 = int_to_ptr.vmem [resolvable:$true] %s30_s16  ;;  %s21_s18 = int_to_ptr.vmem [resolvable:$true] %s20_s18 }
   0x5   :  { %s705_s21 = scalar_lea.hbm %s927_s1, 64 }
   0x6   :  { %p706_p0 = scmp.ne.s32.totalorder %s927_s1, %s705_s21  ;;  %p709_p1 = scmp.lt.u32.totalorder %s705_s21, %s927_s1 }
   0x8   :  { %p711_p2 = pnand %p709_p1, %p706_p0 }
   0xa   :  { %714 = shalt.err (!%p711_p2)
}
   0xb   :  { %s715_s26 = scalar_lea.vmem %s31_s16, 64  ;;  %p720_p4 = scmp.lt.s32.totalorder %s31_s16, %s31_s16 }
   0xc   :  { %p716_p3 = scmp.ne.s32.totalorder %s31_s16, %s715_s26  ;;  %p721_p5 = scmp.lt.s32.totalorder %s715_s26, %s715_s26 }
   0xe   :  { %p722_p6 = por %p721_p5, %p720_p4 }
  0x10   :  { %p723_p7 = pnand %p722_p6, %p716_p3 }
  0x12   :  { %726 = shalt.err (!%p723_p7)
}
  0x13   :  { %33 = dma.hbm_to_vmem [thread:$0]  %s927_s1, 64, %s31_s16, [#allocation8]  }
  0x14   :  { %s727_s5 = scalar_lea.hbm %s926_s0, 64 }
  0x15   :  { %p728_p8 = scmp.ne.s32.totalorder %s926_s0, %s727_s5  ;;  %p731_p9 = scmp.lt.u32.totalorder %s727_s5, %s926_s0 }
  0x17   :  { %p733_p10 = pnand %p731_p9, %p728_p8 }
  0x19   :  { %736 = shalt.err (!%p733_p10)
}
  0x1a   :  { %s737_s10 = scalar_lea.vmem %s21_s18, 64  ;;  %p742_p12 = scmp.lt.s32.totalorder %s21_s18, %s21_s18 }
  0x1b   :  { %p738_p11 = scmp.ne.s32.totalorder %s21_s18, %s737_s10  ;;  %p743_p13 = scmp.lt.s32.totalorder %s737_s10, %s737_s10 }
  0x1d   :  { %p744_p0 = por %p743_p13, %p742_p12 }
  0x1f   :  { %p745_p1 = pnand %p744_p0, %p738_p11 }
  0x21   :  { %748 = shalt.err (!%p745_p1)
}
  0x22   :  { %23 = dma.hbm_to_vmem [thread:$0]  %s926_s0, 64, %s21_s18, [#allocation4]  }
  0x23   :  { %s813_s12 = smov [#allocation9]   ;;  %s749_s16 = scalar_lea.hbm %s928_s2, 17152 }
  0x24   :  { %s39_s13 = sshll.u32 %s813_s12, 4  ;;  %p750_p2 = scmp.ne.s32.totalorder %s928_s2, %s749_s16  ;;  %s40_s13 = int_to_ptr.vmem [resolvable:$true] %s39_s13 }
  0x25   :  { %p753_p3 = scmp.lt.u32.totalorder %s749_s16, %s928_s2 }
  0x27   :  { %p755_p4 = pnand %p753_p3, %p750_p2 }
  0x29   :  { %758 = shalt.err (!%p755_p4)
}
  0x2a   :  { %s759_s22 = scalar_lea.vmem %s40_s13, 17152  ;;  %p764_p6 = scmp.lt.s32.totalorder %s40_s13, %s40_s13 }
  0x2b   :  { %p760_p5 = scmp.ne.s32.totalorder %s40_s13, %s759_s22  ;;  %p765_p7 = scmp.lt.s32.totalorder %s759_s22, %s759_s22 }
  0x2d   :  { %p766_p8 = por %p765_p7, %p764_p6 }
  0x2f   :  { %p767_p9 = pnand %p766_p8, %p760_p5 }
  0x31   :  { %770 = shalt.err (!%p767_p9)
}
  0x32   :  { %s814_s0 = smov 256   ;;  %s815_s18 = smov 16  }
  0x33   :  { %45 = dma.hbm_to_vmem [thread:$0]  %s928_s2, 17152, %s40_s13, [#allocation8], %s814_s0, %s814_s0, %s815_s18  }
  0x34   :  { %803 = dma.done.wait [#allocation4], 64  }
  0x35   :  { %804 = vsyncadd [#allocation4], 4294967232 }
  0x36   :  { %805 = dma.done.wait [#allocation8], 17216  }
  0x37   :  { %806 = vsyncadd [#allocation8], 4294950080  ;;  %v60_v0 = vlaneseq  ;;  %v816_v1 = vmov 1983009808   ;;  %v888_v6 = vld [vmem:[#allocation3] sm:$0xf] }
  0x38   :  { %v58_v2 = vunpack.c.l.s4 %v816_v1  ;;  %vm67_vm0 = vcmask 1041408   ;;  %v114_v15 = vld [vmem:[#allocation9 + $0x100] sm:$0xff]  ;;  %v115_v16 = vld [vmem:[#allocation9 + $0x110] sm:$0xff]  ;;  %vm818_vm1 = vmmov 0   ;;  %s820_s27 = smov [#allocation10]  }
  0x39   :  { %v883_v3 = vshrl.u32 %v60_v0, 7  ;;  %v98_v17 = vld [vmem:[#allocation9] sm:$0xff]  ;;  %v598_v18 = vpack.c.bf16 %v115_v16, %v114_v15  ;;  %v99_v19 = vld [vmem:[#allocation9 + $0x10] sm:$0xff]  ;;  %s486_s28 = sshll.u32 %s820_s27, 4  ;;  %s487_s28 = int_to_ptr.vmem [resolvable:$true] %s486_s28 }
  0x3a   :  { %v59_v4 = vunpack.c.0.s8 %v58_v2  ;;  %v116_v20 = vld [vmem:[#allocation9 + $0x120] sm:$0xff]  ;;  %v117_v21 = vld [vmem:[#allocation9 + $0x130] sm:$0xff]  ;;  %v600_v22 = vpack.c.bf16 %v99_v19, %v98_v17  ;;  %v817_v2 = vmov 0.0|0.0   ;;  %s771_s29 = scalar_lea.vmem %s487_s28, 64  ;;  %p776_p11 = scmp.lt.s32.totalorder %s487_s28, %s487_s28 }
  0x3b   :  { %v602_v23 = vpack.c.bf16 %v117_v21, %v116_v20  ;;  %v100_v24 = vld [vmem:[#allocation9 + $0x20] sm:$0xff]  ;;  %v101_v25 = vld [vmem:[#allocation9 + $0x30] sm:$0xff]  ;;  %599 = vmatprep.subr.bf16.mxu0 %v598_v18  ;;  %630 = vmatprep.subr.bf16.mxu1 %v817_v2  ;;  %p772_p10 = scmp.ne.s32.totalorder %s487_s28, %s771_s29  ;;  %p777_p12 = scmp.lt.s32.totalorder %s771_s29, %s771_s29 }
  0x3c   :  { %v886_v5 = vsub.s32 %v59_v4, %v883_v3  ;;  %601 = vmatpush3.bf16.msra.mxu0 %v600_v22  ;;  %v604_v26 = vpack.c.bf16 %v101_v25, %v100_v24  ;;  %v118_v27 = vld [vmem:[#allocation9 + $0x140] sm:$0xff]  ;;  %v119_v28 = vld [vmem:[#allocation9 + $0x150] sm:$0xff] }
  0x3d   :  { %603 = vmatprep.subr.bf16.mxu0 %v602_v23  ;;  %v606_v29 = vpack.c.bf16 %v119_v28, %v118_v27  ;;  %v102_v30 = vld [vmem:[#allocation9 + $0x40] sm:$0xff]  ;;  %v103_v31 = vld [vmem:[#allocation9 + $0x50] sm:$0xff]  ;;  %p778_p13 = por %p777_p12, %p776_p11 }
  0x3e   :  { %v63_v7 = vrot.slane %v888_v6, %v886_v5  ;;  %v608_v32 = vpack.c.bf16 %v103_v31, %v102_v30  ;;  %v120_v33 = vld [vmem:[#allocation9 + $0x160] sm:$0xff]  ;;  %v121_v34 = vld [vmem:[#allocation9 + $0x170] sm:$0xff] }
  0x3f   :  { %v610_v35 = vpack.c.bf16 %v121_v34, %v120_v33  ;;  %v104_v36 = vld [vmem:[#allocation9 + $0x60] sm:$0xff]  ;;  %v105_v37 = vld [vmem:[#allocation9 + $0x70] sm:$0xff]  ;;  %p779_p0 = pnand %p778_p13, %p772_p10 }
  0x40   :  { %v64_v8 = vcombine.high %v63_v7, %v63_v7  ;;  %v68_v9 = vsel %vm67_vm0, %v63_v7, inf  ;;  %v80_v11 = vsel %vm67_vm0, %v63_v7, -inf  ;;  %605 = vmatpush3.bf16.msra.mxu0 %v604_v26  ;;  %v612_v38 = vpack.c.bf16 %v105_v37, %v104_v36  ;;  %v122_v39 = vld [vmem:[#allocation9 + $0x180] sm:$0xff]  ;;  %v123_v40 = vld [vmem:[#allocation9 + $0x190] sm:$0xff] }
  0x41   :  { %607 = vmatprep.subr.bf16.mxu0 %v606_v29  ;;  %v614_v41 = vpack.c.bf16 %v123_v40, %v122_v39  ;;  %v106_v42 = vld [vmem:[#allocation9 + $0x80] sm:$0xff]  ;;  %v107_v43 = vld [vmem:[#allocation9 + $0x90] sm:$0xff] }
  0x42   :  { %v69_v10 = vsel %vm67_vm0, %v64_v8, inf  ;;  %v81_v12 = vsel %vm67_vm0, %v64_v8, -inf  ;;  %v124_v44 = vld [vmem:[#allocation9 + $0x1a0] sm:$0xff]  ;;  %v616_v45 = vpack.c.bf16 %v107_v43, %v106_v42  ;;  %v125_v46 = vld [vmem:[#allocation9 + $0x1b0] sm:$0xff] }
  0x43   :  { %v70_v13 = vmin.f32 %v68_v9, %v69_v10  ;;  %v82_v14 = vmax.f32 %v80_v11, %v81_v12  ;;  %v108_v47 = vld [vmem:[#allocation9 + $0xa0] sm:$0xff]  ;;  %v109_v48 = vld [vmem:[#allocation9 + $0xb0] sm:$0xff]  ;;  %v618_v49 = vpack.c.bf16 %v125_v46, %v124_v44 }
  0x44   :  { %609 = vmatpush3.bf16.msra.mxu0 %v608_v32  ;;  %v126_v50 = vld [vmem:[#allocation9 + $0x1c0] sm:$0xff]  ;;  %v127_v51 = vld [vmem:[#allocation9 + $0x1d0] sm:$0xff]  ;;  %v620_v52 = vpack.c.bf16 %v109_v48, %v108_v47  ;;  %v819_v48 = vmov 0.0  }
  0x45   :  { %71 = vmin.xlane.f32.xlu0 %v70_v13  ;;  %611 = vmatprep.subr.bf16.mxu0 %v610_v35  ;;  %v622_v53 = vpack.c.bf16 %v127_v51, %v126_v50  ;;  %v110_v54 = vld [vmem:[#allocation9 + $0xc0] sm:$0xff]  ;;  %v111_v55 = vld [vmem:[#allocation9 + $0xd0] sm:$0xff] }
  0x46   :  { %v128_v56 = vld [vmem:[#allocation9 + $0x1e0] sm:$0xff]  ;;  %v129_v57 = vld [vmem:[#allocation9 + $0x1f0] sm:$0xff]  ;;  %v624_v58 = vpack.c.bf16 %v111_v55, %v110_v54  ;;  %595 = vmatprep.mubr.msk.f32.mxu1 %vm818_vm1, %v819_v48 }
  0x47   :  { %v626_v59 = vpack.c.bf16 %v129_v57, %v128_v56  ;;  %v112_v60 = vld [vmem:[#allocation9 + $0xe0] sm:$0xff]  ;;  %v113_v61 = vld [vmem:[#allocation9 + $0xf0] sm:$0xff] }
  0x48   :  { %613 = vmatpush3.bf16.msra.mxu0 %v612_v38  ;;  %v628_v62 = vpack.c.bf16 %v113_v61, %v112_v60  ;;  %v214_v63 = vld [vmem:[#allocation9 + $0x210] sm:$0xff]  ;;  %v215_v0 = vld [vmem:[#allocation9 + $0x220] sm:$0xff] }
  0x49   :  { %83 = vmax.xlane.f32.xlu0 %v82_v14  ;;  %615 = vmatprep.subr.bf16.mxu0 %v614_v41  ;;  %v216_v1 = vld [vmem:[#allocation9 + $0x230] sm:$0xff]  ;;  %v631_v4 = vpack.c.bf16 %v215_v0, %v214_v63  ;;  %v217_v7 = vld [vmem:[#allocation9 + $0x240] sm:$0xff]  ;;  %v316_v0 = vld [vmem:[#allocation9 + $0x388] sm:$0xff] }
  0x4a   :  { %v634_v8 = vpack.c.bf16 %v217_v7, %v216_v1  ;;  %v218_v9 = vld [vmem:[#allocation9 + $0x250] sm:$0xff]  ;;  %v219_v10 = vld [vmem:[#allocation9 + $0x260] sm:$0xff]  ;;  %v318_v1 = vld [vmem:[#allocation9 + $0x398] sm:$0xff] }
  0x4b   :  { %632 = vmatpush3.bf16.msra.mxu1 %v631_v4  ;;  %v637_v11 = vpack.c.bf16 %v219_v10, %v218_v9  ;;  %v220_v12 = vld [vmem:[#allocation9 + $0x270] sm:$0xff]  ;;  %v221_v13 = vld [vmem:[#allocation9 + $0x280] sm:$0xff]  ;;  %v666_v4 = vpack.c.bf16 %v318_v1, %v316_v0  ;;  %v320_v9 = vld [vmem:[#allocation9 + $0x3a8] sm:$0xff] }
  0x4c   :  { %617 = vmatpush3.bf16.msra.mxu0 %v616_v45  ;;  %633 = vmatprep.subr.bf16.mxu1 %v817_v2  ;;  %v640_v14 = vpack.c.bf16 %v221_v13, %v220_v12  ;;  %v222_v15 = vld [vmem:[#allocation9 + $0x290] sm:$0xff]  ;;  %v223_v16 = vld [vmem:[#allocation9 + $0x2a0] sm:$0xff]  ;;  %v322_v10 = vld [vmem:[#allocation9 + $0x3b8] sm:$0xff] }
  0x4d   :  { %619 = vmatprep.subr.bf16.mxu0 %v618_v49  ;;  %v643_v17 = vpack.c.bf16 %v223_v16, %v222_v15  ;;  %v224_v18 = vld [vmem:[#allocation9 + $0x2b0] sm:$0xff]  ;;  %v225_v19 = vld [vmem:[#allocation9 + $0x2c0] sm:$0xff]  ;;  %v306_v49 = vld [vmem:[#allocation9 + $0x338] sm:$0xff]  ;;  %v670_v12 = vpack.c.bf16 %v322_v10, %v320_v9 }
  0x4e   :  { %v646_v20 = vpack.c.bf16 %v225_v19, %v224_v18  ;;  %v226_v42 = vld [vmem:[#allocation9 + $0x2d0] sm:$0xff]  ;;  %v227_v43 = vld [vmem:[#allocation9 + $0x2e0] sm:$0xff]  ;;  %v324_v15 = vld [vmem:[#allocation9 + $0x3c8] sm:$0xff] }
  0x4f   :  { %635 = vmatpush3.bf16.msra.mxu1 %v634_v8  ;;  %v649_v44 = vpack.c.bf16 %v227_v43, %v226_v42  ;;  %v228_v45 = vld [vmem:[#allocation9 + $0x2f0] sm:$0xff]  ;;  %v229_v46 = vld [vmem:[#allocation9 + $0x300] sm:$0xff]  ;;  %v326_v16 = vld [vmem:[#allocation9 + $0x3d8] sm:$0xff] }
  0x50   :  { %621 = vmatpush3.bf16.msra.mxu0 %v620_v52  ;;  %636 = vmatprep.subr.bf16.mxu1 %v817_v2  ;;  %v652_v47 = vpack.c.bf16 %v229_v46, %v228_v45  ;;  %v303_v50 = vld [vmem:[#allocation9 + $0x320] sm:$0xff]  ;;  %v305_v51 = vld [vmem:[#allocation9 + $0x330] sm:$0xff]  ;;  %v308_v52 = vld [vmem:[#allocation9 + $0x348] sm:$0xff]  ;;  %v674_v18 = vpack.c.bf16 %v326_v16, %v324_v15 }
  0x51   :  { %623 = vmatprep.subr.bf16.mxu0 %v622_v53  ;;  %v310_v53 = vld [vmem:[#allocation9 + $0x358] sm:$0xff]  ;;  %v656_v54 = vpack.c.bf16 %v305_v51, %v303_v50  ;;  %v307_v56 = vld [vmem:[#allocation9 + $0x340] sm:$0xff]  ;;  %v309_v57 = vld [vmem:[#allocation9 + $0x350] sm:$0xff] }
  0x52   :  { %v658_v55 = vpack.c.bf16 %v310_v53, %v308_v52  ;;  %v660_v60 = vpack.c.bf16 %v309_v57, %v307_v56  ;;  %v313_v63 = vld [vmem:[#allocation9 + $0x370] sm:$0xff]  ;;  %v315_v7 = vld [vmem:[#allocation9 + $0x380] sm:$0xff]  ;;  %v510_v53 = vld.sshfl [vmem:[#allocation7] sm:$0x33 pattern:$0x76325410] }
  0x53   :  { %638 = vmatpush3.bf16.msra.mxu1 %v637_v11  ;;  %v317_v8 = vld [vmem:[#allocation9 + $0x390] sm:$0xff]  ;;  %v319_v13 = vld [vmem:[#allocation9 + $0x3a0] sm:$0xff]  ;;  %v444_v57 = vcombine.high %v510_v53, %v510_v53 }
  0x54   :  { %625 = vmatpush3.bf16.msra.mxu0 %v624_v58  ;;  %639 = vmatprep.subr.bf16.mxu1 %v817_v2  ;;  %v312_v58 = vld [vmem:[#allocation9 + $0x368] sm:$0xff]  ;;  %v668_v11 = vpack.c.bf16 %v317_v8, %v315_v7  ;;  %v323_v19 = vld [vmem:[#allocation9 + $0x3c0] sm:$0xff] }
  0x55   :  { %627 = vmatprep.subr.bf16.mxu0 %v626_v59  ;;  %v314_v59 = vld [vmem:[#allocation9 + $0x378] sm:$0xff] }
  0x56   :  { %v662_v61 = vpack.c.bf16 %v314_v59, %v312_v58 }
  0x57   :  { %641 = vmatpush3.bf16.msra.mxu1 %v640_v14  ;;  %v321_v14 = vld [vmem:[#allocation9 + $0x3b0] sm:$0xff] }
  0x58   :  { %629 = vmatpush3.bf16.msra.mxu0 %v628_v62  ;;  %642 = vmatprep.subr.bf16.mxu1 %v817_v2  ;;  %v311_v62 = vld [vmem:[#allocation9 + $0x360] sm:$0xff] }
  0x5b   :  { %644 = vmatpush3.bf16.msra.mxu1 %v643_v17  ;;  %v672_v17 = vpack.c.bf16 %v321_v14, %v319_v13 }
  0x5c   :  { %645 = vmatprep.subr.bf16.mxu1 %v817_v2 }
  0x5f   :  { %647 = vmatpush3.bf16.msra.mxu1 %v646_v20  ;;  %v325_v20 = vld [vmem:[#allocation9 + $0x3d0] sm:$0xff] }
  0x60   :  { %648 = vmatprep.subr.bf16.mxu1 %v817_v2 }
  0x63   :  { %650 = vmatpush3.bf16.msra.mxu1 %v649_v44 }
  0x64   :  { %651 = vmatprep.subr.bf16.mxu1 %v817_v2  ;;  %v664_v2 = vpack.c.bf16 %v313_v63, %v311_v62 }
  0x67   :  { %653 = vmatpush3.bf16.msra.mxu1 %v652_v47  ;;  %v340_v47 = vsub.s32 0, %v883_v3 }
  0xd2   :  { %v72_v21 = vpop.xlane.xlu0 %71 }
  0xd3   :  { %v73_v22 = vrot.slane %v72_v21, 4 }
  0xd5   :  { %v74_v23 = vmin.f32 %v72_v21, %v73_v22  ;;  %v328_v21 = vld [vmem:[#allocation9 + $0x3e8] sm:$0xff]  ;;  %v330_v22 = vld [vmem:[#allocation9 + $0x3f8] sm:$0xff] }
  0xd6   :  { %v84_v24 = vpop.xlane.xlu0 %83 }
  0xd7   :  { %v75_v25 = vrot.slane %v74_v23, 2  ;;  %v85_v26 = vrot.slane %v84_v24, 4 }
  0xd9   :  { %v86_v27 = vmax.f32 %v84_v24, %v85_v26  ;;  %v76_v28 = vmin.f32 %v74_v23, %v75_v25  ;;  %v676_v23 = vpack.c.bf16 %v325_v20, %v323_v19  ;;  %v678_v24 = vpack.c.bf16 %v330_v22, %v328_v21  ;;  %v130_v26 = vld [vmem:[#allocation9 + $0x200] ss:$0 sm:$0xff] }
  0xdb   :  { %v87_v29 = vrot.slane %v86_v27, 2  ;;  %v77_v30 = vrot.slane %v76_v28, 1 }
  0xdd   :  { %v88_v31 = vmax.f32 %v86_v27, %v87_v29  ;;  %v78_v32 = vmin.f32 %v76_v28, %v77_v30 }
  0xdf   :  { %686 = vpush %v78_v32  ;;  %v89_v33 = vrot.slane %v88_v31, 1  ;;  %v327_v32 = vld [vmem:[#allocation9 + $0x3e0] sm:$0xff] }
  0xe1   :  { %v90_v34 = vmax.f32 %v88_v31, %v89_v33  ;;  %v329_v33 = vld [vmem:[#allocation9 + $0x3f0] sm:$0xff] }
  0xe3   :  { %688 = vpush %v90_v34  ;;  %v680_v34 = vpack.c.bf16 %v329_v33, %v327_v32 }
 0x110   :  { %s687_s2 = spop %686 }
 0x111   :  { %v92_v36 = vstv %s687_s2 }
 0x112   :  { %v93_v37 = vsub.f32 %v888_v6, %v92_v36  ;;  %v304_v6 = vld [vmem:[#allocation9 + $0x328] sm:$0xff]  ;;  %v334_v36 = vld [vmem:[#allocation9 + $0x418] sm:$0xff] }
 0x114   :  { %s689_s25 = spop %688 }
 0x115   :  { %s94_s26 = ssub.f32 %s689_s25, %s687_s2 }
 0x117   :  { %v95_v35 = vstv %s94_s26 }
 0x118   :  { %703 = vrcp.f32 %v95_v35  ;;  %v332_v35 = vld [vmem:[#allocation9 + $0x408] sm:$0xff] }
 0x122   :  { %v704_v38 = vpop.eup %703 }
 0x123   :  { %v97_v39 = vmul.f32 %v704_v38, %v93_v37  ;;  %v682_v37 = vpack.c.bf16 %v334_v36, %v332_v35  ;;  %v331_v38 = vld [vmem:[#allocation9 + $0x400] sm:$0xff] }
 0x125   :  { %v138_v40 = vrot.slane %v97_v39, %v886_v5  ;;  %v654_v5 = vpack.c.bf16 %v306_v49, %v304_v6  ;;  %v333_v39 = vld [vmem:[#allocation9 + $0x410] sm:$0xff]  ;;  %v344_v6 = vsub.s32 1, %v883_v3 }
 0x127   :  { %v139_v41 = vcombine.high %v138_v40, %v138_v40  ;;  %655 = vmatprep.subr.bf16.mxu0 %v654_v5 }
 0x129   :  { %206 = vmatprep.mubr.f32.mxu0 %v139_v41  ;;  %v230_v41 = vld [vmem:[#allocation9 + $0x310] ss:$0 sm:$0xff] }
 0x12a   :  { %207 = vmatmul.mubr.f32.vlgmr.msra.gmra.mrb[0].mxu0 %v138_v40  ;;  %v684_v40 = vpack.c.bf16 %v333_v39, %v331_v38 }
 0x12b   :  { %412 = vmatprep.mubr.f32.mxu0 %v819_v48  ;;  %657 = vmatpush1.bf16.msra.mxu0 %v656_v54  ;;  %v336_v48 = vld [vmem:[#allocation9 + $0x420] ss:$8 sm:$0x3] }
 0x12c   :  { %659 = vmatprep.subr.bf16.mxu0 %v658_v55  ;;  %v341_v49 = vrot.slane %v336_v48, %v340_v47  ;;  %v345_v50 = vrot.slane %v336_v48, %v344_v6 }
 0x12f   :  { %661 = vmatpush1.bf16.msra.mxu0 %v660_v60 }
 0x130   :  { %663 = vmatprep.subr.bf16.mxu0 %v662_v61 }
 0x133   :  { %665 = vmatpush1.bf16.msra.mxu0 %v664_v2 }
 0x134   :  { %667 = vmatprep.subr.bf16.mxu0 %v666_v4 }
 0x137   :  { %669 = vmatpush1.bf16.msra.mxu0 %v668_v11 }
 0x138   :  { %671 = vmatprep.subr.bf16.mxu0 %v670_v12 }
 0x13b   :  { %673 = vmatpush1.bf16.msra.mxu0 %v672_v17 }
 0x13c   :  { %675 = vmatprep.subr.bf16.mxu0 %v674_v18 }
 0x13f   :  { %677 = vmatpush1.bf16.msra.mxu0 %v676_v23 }
 0x140   :  { %679 = vmatprep.subr.bf16.mxu0 %v678_v24 }
 0x143   :  { %681 = vmatpush1.bf16.msra.mxu0 %v680_v34 }
 0x144   :  { %683 = vmatprep.subr.bf16.mxu0 %v682_v37 }
 0x147   :  { %685 = vmatpush1.bf16.msra.mxu0 %v684_v40 }
 0x1fd   :  { %v543_v25 = vpop.f32.mrb[0].mxu0 }
 0x1fe   :  { %v544_v27 = vpop.f32.mrb[1].mxu0 }
 0x1ff   :  { %v545_v28 = vadd.f32 %v544_v27, %v543_v25 }
 0x201   :  { %v209_v29 = vadd.f32 %v545_v28, %v130_v26 }
 0x203   :  { %v212_v30 = vmul.f32 0.01, %v209_v29 }
 0x205   :  { %v213_v31 = vmax.f32 %v209_v29, %v212_v30 }
 0x207   :  { %596 = vmatmul.mubr.f32.vlgmr.msra.gmra.mrb[0].mxu1 %v213_v31 }
 0x2da   :  { %v297_v42 = vpop.f32.mrb[0].mxu1 }
 0x2db   :  { %v298_v43 = vadd.f32 %v297_v42, %v230_v41  ;;  %v597_v44 = vpop.f32.mrb[1].mxu1 }
 0x2dd   :  { %v301_v45 = vmul.f32 0.01, %v298_v43 }
 0x2df   :  { %v302_v46 = vmax.f32 %v298_v43, %v301_v45 }
 0x2e1   :  { %413 = vmatmul.mubr.f32.vlgmr.msra.gmra.mrb[2].mxu0 %v302_v46 }
 0x3b4   :  { %v414_v5 = vpop.f32.mrb[2].mxu0 }
 0x3b5   :  { %v415_v51 = vadd.f32 %v414_v5, %v341_v49  ;;  %v416_v52 = vpop.f32.mrb[3].mxu0 }
 0x3b6   :  { %v417_v54 = vadd.f32 %v416_v52, %v345_v50 }
 0x3b7   :  { %v419_v55 = vmul.f32 0.01, %v415_v51 }
 0x3b8   :  { %v420_v56 = vmul.f32 0.01, %v417_v54 }
 0x3b9   :  { %v421_v58 = vmax.f32 %v415_v51, %v419_v55 }
 0x3ba   :  { %v422_v59 = vmax.f32 %v417_v54, %v420_v56 }
 0x3bb   :  { %v447_v60 = vsub.f32 %v421_v58, %v510_v53 }
 0x3bc   :  { %v448_v61 = vsub.f32 %v422_v59, %v444_v57  ;;  %v425_v62 = vcombine.low %v421_v58, %v422_v59 }
 0x3bd   :  { %v449_v63 = vmul.f32 %v447_v60, %v447_v60 }
 0x3be   :  { %v450_v0 = vmul.f32 %v448_v61, %v448_v61  ;;  %509 = vst.sshfl [vmem:[#allocation10] sm:$0x33 pattern:$0x76325410] %v425_v62 }
 0x3bf   :  { %v451_v3 = vsel %vm67_vm0, %v449_v63, 0.0 }
 0x3c0   :  { %v452_v1 = vsel %vm67_vm0, %v450_v0, 0.0 }
 0x3c1   :  { %v453_v2 = vadd.f32 %v452_v1, %v451_v3 }
 0x3c3   :  { %454 = vadd.xlane.f32.xlu1 %v453_v2 }
 0x3c4   :  { %782 = shalt.err (!%p779_p0)
}
 0x3c5   :  { %s783_s6 = scalar_lea.hbm %s929_s3, 64 }
 0x3c6   :  { %p784_p1 = scmp.ne.s32.totalorder %s929_s3, %s783_s6  ;;  %p787_p2 = scmp.lt.u32.totalorder %s783_s6, %s929_s3 }
 0x3c8   :  { %p789_p3 = pnand %p787_p2, %p784_p1 }
 0x3ca   :  { %792 = shalt.err (!%p789_p3)
}
 0x3cb   :  { %489 = dma.vmem_to_hbm [thread:$0]  %s487_s28, 64, %s929_s3, [#allocation5]  }
 0x3cc   :  { %s793_s16 = scalar_lea.hbm %s930_s4, 16 }
 0x3cd   :  { %p794_p4 = scmp.ne.s32.totalorder %s930_s4, %s793_s16  ;;  %p797_p5 = scmp.lt.u32.totalorder %s793_s16, %s930_s4 }
 0x3cf   :  { %p799_p6 = pnand %p797_p5, %p794_p4 }
 0x450   :  { %v455_v4 = vpop.xlane.xlu1 %454 }
 0x451   :  { %v456_v7 = vrot.slane %v455_v4, 4 }
 0x453   :  { %v457_v8 = vadd.f32 %v456_v7, %v455_v4 }
 0x455   :  { %v458_v9 = vrot.slane %v457_v8, 2 }
 0x457   :  { %v459_v10 = vadd.f32 %v458_v9, %v457_v8 }
 0x459   :  { %v460_v11 = vrot.slane %v459_v10, 1 }
 0x45b   :  { %v461_v12 = vadd.f32 %v460_v11, %v459_v10 }
 0x45d   :  { %690 = vpush %v461_v12 }
 0x48e   :  { %s691_s12 = spop %690 }
 0x48f   :  { %s477_s13 = smul.f32 0.001953125, %s691_s12 }
 0x491   :  { %479 = sst [smem:[#allocation11]] %s477_s13 }
 0x492   :  { %802 = shalt.err (!%p799_p6)
}
 0x493   :  { %s821_s21 = smov [#allocation11]  }
 0x494   :  { %497 = dma.smem_to_hbm %s821_s21, 16, %s930_s4, [#allocation6]  }
 0x495   :  { %807 = dma.done.wait [#allocation5], 64  }
 0x496   :  { %808 = vsyncadd [#allocation5], 4294967232 }
 0x497   :  { %809 = dma.done.wait [#allocation6], 16  }
 0x498   :  { %810 = vsyncadd [#allocation6], 4294967280 }
 0x499   :  { %504 = sfence }
 0x49a   :  { %505 = vsyncpa [#allocation4], 1 }
 0x49b   :  { %506 = vsyncpa [#allocation8], 1 }
 0x49c   :  { %507 = vsyncpa [#allocation5], 1 }
 0x49d   :  { %508 = vsyncpa [#allocation6], 1 }

</bundles_post_ra>
